<compile_context>
chip_gen: v7x
topology: tpu7x:2x2x1
jax: 0.10.0
libtpu: 0.0.40
codegen_flags: <defaults>
</compile_context>

<pallas_src>
import jax
import jax.numpy as jnp
from jax import lax
from jax.experimental import pallas as pl
from jax.experimental.pallas import tpu as pltpu


def _one_hot_kernel(ids_ref, out_ref):
    # ids_ref: (ROW_TILE, 1) int32; out_ref: (ROW_TILE, CLASS_TILE) float32.
    class_tile = out_ref.shape[1]
    # Move the class-tile offset onto the (R, 1) ids (cheap) rather than the
    # (R, C) iota (one VALU op per output element).
    ids_local = ids_ref[...] - pl.program_id(1) * class_tile          # (R, 1)
    lanes = lax.broadcasted_iota(jnp.int32, out_ref.shape, 1)         # (R, C_t)
    out_ref[...] = (ids_local == lanes).astype(jnp.float32)


def _vmem_capacity_bytes():
    """Best-effort physical VMEM query; conservative (v7x-sized) fallback."""
    try:
        return int(pltpu.get_tpu_info().vmem_capacity_bytes)
    except Exception:
        return 64 << 20


def _choose_budgets():
    cap = _vmem_capacity_bytes()
    if cap >= 100 * 1024 * 1024:
        # v5e / v6e: 128 MiB physical VMEM -> big blocks, generous limit.
        return 16 * 1024 * 1024, 64 << 20
    # v7x: 64 MiB physical -> cap blocks at ~8 MiB, explicit ~48 MiB limit.
    return 8 * 1024 * 1024, 48 << 20


def _choose_tiles(n_rows, num_classes, block_budget_bytes):
    """Pick (row_tile, class_tile).

    Legality: last block dim must be a multiple of 128 OR the full dim;
    second-to-last must be a multiple of 8 OR the full dim.  Ragged edge
    blocks are handled by Pallas with masked stores.
    """
    if num_classes <= 4096:
        class_tile = num_classes                     # full dim (always legal)
    else:
        class_tile = 2048                            # multiple of 128
    c_lanes = pl.cdiv(class_tile, 128) * 128         # lane-padded width in VMEM

    max_rows = max(8, (block_budget_bytes // (c_lanes * 4)) // 8 * 8)
    # Cap rows so the two lane-padded ids buffers (row_tile*128*4 B each) stay
    # small relative to the output double-buffer.
    row_tile = min(max_rows, 8192)

    if n_rows <= row_tile:
        if n_rows > 1024:
            # Keep >= 2 row tiles so both v7x TensorCores get work
            # (neutral on single-TC v5e/v6e).
            row_tile = pl.cdiv(n_rows, 16) * 8
        else:
            row_tile = n_rows                        # single full-dim block
    return row_tile, class_tile


def one_hot_encoder(x, num_classes):
    """Pallas equivalent of F.one_hot(x, num_classes).float().

    Note: negative / out-of-range ids produce an all-zero row (jax.nn.one_hot
    semantics); torch.nn.functional.one_hot would raise instead.
    # TODO(synk): add explicit validation if strict PyTorch error parity is needed.
    """
    orig_shape = x.shape
    ids = x.reshape(-1, 1).astype(jnp.int32)
    n = ids.shape[0]

    block_budget, vmem_limit = _choose_budgets()
    row_tile, class_tile = _choose_tiles(n, num_classes, block_budget)

    # Exact output shape: ragged edge blocks are masked by Pallas, interior
    # blocks are full unmasked stores, and there is no post-kernel slice.
    grid = (pl.cdiv(n, row_tile), pl.cdiv(num_classes, class_tile))

    cost = pl.CostEstimate(
        flops=n * num_classes,                       # compare+select, not MACs
        transcendentals=0,
        bytes_accessed=n * num_classes * 4 + n * 4,  # pure HBM-store bound
    )

    out = pl.pallas_call(
        _one_hot_kernel,
        out_shape=jax.ShapeDtypeStruct((n, num_classes), jnp.float32),
        grid_spec=pltpu.PrefetchScalarGridSpec(
            num_scalar_prefetch=0,
            grid=grid,
            # ids block index is independent of the inner class axis j, so its
            # DMA is elided across the inner loop.  Keep class axis innermost.
            in_specs=[pl.BlockSpec((row_tile, 1), lambda i, j: (i, 0))],
            out_specs=pl.BlockSpec((row_tile, class_tile),
                                   lambda i, j: (i, j)),
        ),
        compiler_params=pltpu.CompilerParams(
            dimension_semantics=("parallel", "parallel"),
            vmem_limit_bytes=vmem_limit,
        ),
        cost_estimate=cost,
    )(ids)

    return out.reshape(*orig_shape, num_classes)


if __name__ == "__main__":
    key = jax.random.PRNGKey(0)

    # Case 1: class axis exactly one vreg wide (unmasked stores everywhere).
    num_classes = 128
    x = jax.random.randint(key, (2, 8), minval=0, maxval=num_classes,
                           dtype=jnp.int32)
    y = jax.block_until_ready(one_hot_encoder(x, num_classes))
    ref = jax.nn.one_hot(x, num_classes, dtype=jnp.float32)
    assert y.shape == (2, 8, num_classes)
    assert y.dtype == jnp.float32
    assert bool(jnp.all(y == ref))

    # Case 2: ragged class axis < 128 (full-dim class tile, masked lane edge).
    num_classes2 = 37
    x2 = jax.random.randint(jax.random.PRNGKey(1), (3, 5),
                            minval=0, maxval=num_classes2, dtype=jnp.int32)
    y2 = jax.block_until_ready(one_hot_encoder(x2, num_classes2))
    ref2 = jax.nn.one_hot(x2, num_classes2, dtype=jnp.float32)
    assert y2.shape == (3, 5, num_classes2)
    assert bool(jnp.all(y2 == ref2))

    # Case 3: ragged rows and class axis > 128, not a multiple of 128.
    num_classes3 = 130
    x3 = jax.random.randint(jax.random.PRNGKey(2), (19,),
                            minval=0, maxval=num_classes3, dtype=jnp.int32)
    y3 = jax.block_until_ready(one_hot_encoder(x3, num_classes3))
    ref3 = jax.nn.one_hot(x3, num_classes3, dtype=jnp.float32)
    assert y3.shape == (19, num_classes3)
    assert bool(jnp.all(y3 == ref3))

    print("KERNEL_OK")
</pallas_src>

<mosaic_0001>
module attributes {stable_mosaic.version = 11 : i64} {
  func.func @_one_hot_kernel(%arg0: i32, %arg1: i32, %arg2: memref<16x1xi32, #tpu.memory_space<vmem>>, %arg3: memref<16x128xf32, #tpu.memory_space<vmem>>) attributes {dimension_semantics = [#tpu.dimension_semantics<parallel>, #tpu.dimension_semantics<parallel>], iteration_bounds = array<i64: 1, 1>, scalar_prefetch = 0 : i64, scratch_operands = 0 : i64, tpu.core_type = #tpu.core_type<tc>, window_params = [{transform_indices = @transform_0, window_bounds = array<i64: 16, 1>}, {transform_indices = @transform_1, window_bounds = array<i64: 16, 128>}]} {
    %c0 = arith.constant 0 : index
    %c0_0 = arith.constant 0 : index
    %0 = vector.load %arg2[%c0, %c0_0] : memref<16x1xi32, #tpu.memory_space<vmem>>, vector<16x1xi32>
    %c128_i32 = arith.constant 128 : i32
    %1 = arith.muli %arg1, %c128_i32 : i32
    %2 = vector.broadcast %1 : i32 to vector<16x1xi32>
    %3 = arith.subi %0, %2 : vector<16x1xi32>
    %4 = tpu.iota {dimensions = array<i32: 1>} : vector<16x128xi32>
    %5 = vector.broadcast %3 : vector<16x1xi32> to vector<16x128xi32>
    %6 = arith.cmpi eq, %5, %4 : vector<16x128xi32>
    %7 = arith.extui %6 : vector<16x128xi1> to vector<16x128xi32>
    %8 = arith.sitofp %7 : vector<16x128xi32> to vector<16x128xf32>
    %c0_1 = arith.constant 0 : index
    %c0_2 = arith.constant 0 : index
    %9 = vector.load %arg3[%c0_1, %c0_2] : memref<16x128xf32, #tpu.memory_space<vmem>>, vector<16x128xf32>
    tpu.vector_store %arg3[%c0_1, %c0_2], %8 {strides = array<i32>} : memref<16x128xf32, #tpu.memory_space<vmem>>, vector<16x128xf32>,
    return
  }
  func.func @transform_0(%arg0: i32, %arg1: i32) -> (i32, i32) {
    %c0_i32 = arith.constant 0 : i32
    %c0_i32_0 = arith.constant 0 : i32
    return %arg0, %c0_i32 : i32, i32
  }
  func.func @transform_1(%arg0: i32, %arg1: i32) -> (i32, i32) {
    %c0_i32 = arith.constant 0 : i32
    return %arg0, %arg1 : i32, i32
  }
}

</mosaic_0001>

<bundles_post_ra>
// kernel: tpu_custom_call.1
= control target key start
LH: loop header
LB: loop body
LE: loop exit
PB: predicated region body
PF: predicated region fallthrough
CT: control target
= control target key end

     0   :  { %s112_s0 = inlined_call_operand.vmem [shape: s32[16,1], index: 0, kind: input, shape index: {}]   ;;  %s113_s1 = inlined_call_operand.hbm [shape: f32[16,128], index: 1, kind: output, shape index: {}]  }
   0x1   :  { %v9_v0 = vld [vmem:[%s112_s0] sm:$0xff] }
   0x2   :  { %6 = vsyncpa [#allocation3], 0  ;;  %v79_v1 = vmov 0   ;;  %v10_v2 = vld [vmem:[%s112_s0 + $0x8] sm:$0xff]  ;;  %v15_v3 = vlaneseq  ;;  %s80_s10 = smov [#allocation2]   ;;  %v81_v6 = vmov 0.0  }
   0x3   :  { %54 = vset.pattern.permute.xlu0 %v79_v1  ;;  %s36_s11 = sshll.u32 %s80_s10, 4  ;;  %s37_s11 = int_to_ptr.vmem [resolvable:$true] %s36_s11 }
   0x4   :  { %18 = vperm.xlu0 %54, %v9_v0   ;;  %v16_v4 = vand.u32 127, %v15_v3  ;;  %s55_s12 = scalar_lea.vmem %s37_s11, 256  ;;  %p60_p1 = scmp.lt.s32.totalorder %s37_s11, %s37_s11 }
   0x5   :  { %p56_p0 = scmp.ne.s32.totalorder %s37_s11, %s55_s12  ;;  %p61_p2 = scmp.lt.s32.totalorder %s55_s12, %s55_s12 }
   0x7   :  { %p62_p3 = por %p61_p2, %p60_p1 }
   0x8   :  { %21 = vperm.xlu0 %54, %v10_v2  }
   0x9   :  { %p63_p4 = pnand %p62_p3, %p56_p0 }
  0x83   :  { %v19_v5 = vpop.permute.xlu0 %18 }
  0x84   :  { %vm23_vm0 = vcmp.eq.s32.totalorder %v19_v5, %v16_v4 }
  0x85   :  { %v47_v7 = vsel %vm23_vm0, 1.0, %v81_v6 }
  0x86   :  { %29 = vst [vmem:[#allocation2] sm:$0xff] %v47_v7 }
  0x87   :  { %v22_v8 = vpop.permute.xlu0 %21 }
  0x88   :  { %vm24_vm1 = vcmp.eq.s32.totalorder %v22_v8, %v16_v4 }
  0x89   :  { %v48_v9 = vsel %vm24_vm1, 1.0, %v81_v6 }
  0x8a   :  { %30 = vst [vmem:[#allocation2 + $0x8] sm:$0xff] %v48_v9 }
  0x8b   :  { %66 = shalt.err (!%p63_p4)
}
  0x8c   :  { %s67_s14 = scalar_lea.hbm %s113_s1, 256 }
  0x8d   :  { %p68_p5 = scmp.ne.s32.totalorder %s113_s1, %s67_s14  ;;  %p71_p6 = scmp.lt.u32.totalorder %s67_s14, %s113_s1 }
  0x8f   :  { %p73_p7 = pnand %p71_p6, %p68_p5 }
  0x91   :  { %76 = shalt.err (!%p73_p7)
}
  0x92   :  { %s82_s19 = smov 128   ;;  %s83_s20 = smov 8  }
  0x93   :  { %42 = dma.vmem_to_hbm [thread:$0]  %s37_s11, 256, %s113_s1, [#allocation3], %s82_s19, %s82_s19, %s83_s20  }
  0x94   :  { %77 = dma.done.wait [#allocation3], 256  }
  0x95   :  { %78 = vsyncadd [#allocation3], 4294967040 }
  0x96   :  { %46 = vsyncpa [#allocation3], 1 }

</bundles_post_ra>
